<compile_context>
chip_gen: v7x
topology: tpu7x:2x2x1
jax: 0.10.0
libtpu: 0.0.40
codegen_flags: <defaults>
</compile_context>

<pallas_src>
import functools

import jax
import jax.numpy as jnp
from jax.experimental import pallas as pl
from jax.experimental.pallas import tpu as pltpu

H1, H2 = 400, 300      # hidden sizes of the PyTorch module
LANE, SUB = 128, 8     # TPU lane / sublane quanta


def _round_up(n, m):
    return (n + m - 1) // m * m


# --------------------------------------------------------------------------
# Kernel (shared by the latency path and the batched grid path)
# --------------------------------------------------------------------------
def anet_kernel(x_ref, w1_ref, b1_ref, w2_ref, b2_ref, w3_ref, b3_ref, out_ref):
    # x: (TB, Sp) f32 or bf16; weights bf16 (in, out), zero-padded;
    # biases f32 (1, out).
    x = x_ref[...].astype(jnp.bfloat16)

    # fc1 + ReLU   (TB, Sp) @ (Sp, 512) -> f32 accumulate on MXU
    h1 = jnp.dot(x, w1_ref[...], preferred_element_type=jnp.float32)
    h1 = jnp.maximum(h1 + b1_ref[...], 0.0)

    # fc2 + ReLU   (TB, 512) @ (512, 384)
    h2 = jnp.dot(h1.astype(jnp.bfloat16), w2_ref[...],
                 preferred_element_type=jnp.float32)
    h2 = jnp.maximum(h2 + b2_ref[...], 0.0)

    # out + tanh, scaled by 2   (TB, 384) @ (384, 128)  -- lane-dense output
    o = jnp.dot(h2.astype(jnp.bfloat16), w3_ref[...],
                preferred_element_type=jnp.float32)
    o = o + b3_ref[...]
    out_ref[...] = (jnp.tanh(o) * 2.0).astype(out_ref.dtype)


# --------------------------------------------------------------------------
# Host-side parameter preparation (pad + cast ONCE, reuse across calls)
# --------------------------------------------------------------------------
def prepare_params(params):
    w1, b1 = params["w1"], params["b1"]   # (s_dim, 400), (1, 400)   f32
    w2, b2 = params["w2"], params["b2"]   # (400, 300),   (1, 300)   f32
    w3, b3 = params["w3"], params["b3"]   # (300, a_dim), (1, a_dim) f32
    s_dim, a_dim = w1.shape[0], w3.shape[1]

    sp = _round_up(s_dim, SUB)     # 3   -> 8
    h1p = _round_up(H1, LANE)      # 400 -> 512
    h2p = _round_up(H2, LANE)      # 300 -> 384
    ap = _round_up(a_dim, LANE)    # 1   -> 128

    def pad(a, shape):
        return jnp.pad(a, [(0, t - s) for s, t in zip(a.shape, shape)])

    pp = {
        "w1": pad(w1, (sp, h1p)).astype(jnp.bfloat16),
        "b1": pad(b1, (1, h1p)).astype(jnp.float32),
        "w2": pad(w2, (h1p, h2p)).astype(jnp.bfloat16),
        "b2": pad(b2, (1, h2p)).astype(jnp.float32),
        "w3": pad(w3, (h2p, ap)).astype(jnp.bfloat16),
        "b3": pad(b3, (1, ap)).astype(jnp.float32),
    }
    return pp, s_dim, a_dim


def _cost(bp, sp, h1p, h2p, ap, pp, x_bytes):
    flops = 2 * bp * (sp * h1p + h1p * h2p + h2p * ap)
    bytes_accessed = (
        x_bytes
        + sum(int(a.size) * a.dtype.itemsize for a in pp.values())
        + bp * ap * 4
    )
    return pl.CostEstimate(flops=flops, transcendentals=bp * ap,
                           bytes_accessed=bytes_accessed)


# --------------------------------------------------------------------------
# Latency path: grid-less, for the B=2 per-control-step actor call
# --------------------------------------------------------------------------
def anet_forward(x, pp, a_dim):
    """x: (B, s_dim) f32. pp: prepared (padded, bf16) params. Returns (B, a_dim)."""
    B, s_dim = x.shape
    sp, h1p = pp["w1"].shape
    h2p = pp["w2"].shape[1]
    ap = pp["w3"].shape[1]
    Bp = _round_up(B, SUB)

    # Keep x in f32 on the latency path (256 bytes; preserves mantissa until
    # the single in-kernel bf16 cast).  Under jit this pad fuses into dispatch.
    xp = jnp.pad(x.astype(jnp.float32), ((0, Bp - B), (0, sp - s_dim)))

    full = lambda arr: pl.BlockSpec(arr.shape, lambda: (0,) * arr.ndim)

    out_p = pl.pallas_call(
        anet_kernel,
        out_shape=jax.ShapeDtypeStruct((Bp, ap), jnp.float32),
        in_specs=[full(xp), full(pp["w1"]), full(pp["b1"]),
                  full(pp["w2"]), full(pp["b2"]),
                  full(pp["w3"]), full(pp["b3"])],
        out_specs=pl.BlockSpec((Bp, ap), lambda: (0, 0)),
        cost_estimate=_cost(Bp, sp, h1p, h2p, ap, pp, Bp * sp * 4),
        compiler_params=pltpu.CompilerParams(vmem_limit_bytes=4 << 20),
    )(xp, pp["w1"], pp["b1"], pp["w2"], pp["b2"], pp["w3"], pp["b3"])

    return out_p[:B, :a_dim]


# --------------------------------------------------------------------------
# Throughput path: 1-D batch grid, weights loaded into VMEM once and reused
# --------------------------------------------------------------------------
def anet_forward_batched(x, pp, a_dim, tb=128):
    """x: (B, s_dim) f32, B large (rollout / vectorized envs).

    Grid over batch tiles of `tb` rows; all weight BlockSpecs return a
    constant block so the ~0.5 MB of weights is DMA'd once per call and
    reused across every grid step.  Batch axis is "parallel" so the two v7x
    TensorCores split it.
    """
    B, s_dim = x.shape
    sp, h1p = pp["w1"].shape
    h2p = pp["w2"].shape[1]
    ap = pp["w3"].shape[1]
    Bp = _round_up(B, tb)

    # bf16 x halves the per-tile input DMA; numerics unchanged (the kernel
    # casts to bf16 anyway).  Under jit this pad+cast fuses into one op.
    xp = jnp.pad(x, ((0, Bp - B), (0, sp - s_dim))).astype(jnp.bfloat16)

    # Weights/biases: constant block index -> fetched once, VMEM-resident.
    wspec = lambda arr: pl.BlockSpec(arr.shape, lambda i: (0,) * arr.ndim)

    out_p = pl.pallas_call(
        anet_kernel,
        out_shape=jax.ShapeDtypeStruct((Bp, ap), jnp.float32),
        grid=(Bp // tb,),
        in_specs=[pl.BlockSpec((tb, sp), lambda i: (i, 0)),
                  wspec(pp["w1"]), wspec(pp["b1"]),
                  wspec(pp["w2"]), wspec(pp["b2"]),
                  wspec(pp["w3"]), wspec(pp["b3"])],
        out_specs=pl.BlockSpec((tb, ap), lambda i: (i, 0)),
        cost_estimate=_cost(Bp, sp, h1p, h2p, ap, pp, Bp * sp * 2),
        compiler_params=pltpu.CompilerParams(
            dimension_semantics=("parallel",),   # megacore split on v7x
            vmem_limit_bytes=16 << 20),
    )(xp, pp["w1"], pp["b1"], pp["w2"], pp["b2"], pp["w3"], pp["b3"])

    return out_p[:B, :a_dim]


# --------------------------------------------------------------------------
# Init + references
# --------------------------------------------------------------------------
def init_params(key, s_dim, a_dim):
    """weights ~ N(0, 0.1) (as the PyTorch module sets); biases use PyTorch's
    default Linear init uniform(-1/sqrt(fan_in), 1/sqrt(fan_in))."""
    ks = jax.random.split(key, 6)

    def wb(kw, kb, fan_in, fan_out):
        w = 0.1 * jax.random.normal(kw, (fan_out, fan_in), jnp.float32)
        bound = 1.0 / jnp.sqrt(jnp.float32(fan_in))
        b = jax.random.uniform(kb, (1, fan_out), jnp.float32, -bound, bound)
        return w.T, b   # pre-transpose to (in, out)

    w1, b1 = wb(ks[0], ks[1], s_dim, 400)
    w2, b2 = wb(ks[2], ks[3], 400, 300)
    w3, b3 = wb(ks[4], ks[5], 300, a_dim)
    return {"w1": w1, "b1": b1, "w2": w2, "b2": b2, "w3": w3, "b3": b3}


def anet_reference_bf16(x, pp, a_dim):
    """Mirrors the kernel numerics (bf16 inputs to each dot, f32 accumulate)."""
    def lin(a, w, b):
        return jnp.dot(a.astype(jnp.bfloat16).astype(jnp.float32),
                       w.astype(jnp.float32)) + b
    sp = pp["w1"].shape[0]
    xp = jnp.pad(x, ((0, 0), (0, sp - x.shape[1])))
    h1 = jnp.maximum(lin(xp, pp["w1"], pp["b1"]), 0.0)
    h2 = jnp.maximum(lin(h1, pp["w2"], pp["b2"]), 0.0)
    o = lin(h2, pp["w3"], pp["b3"])
    return (jnp.tanh(o) * 2.0)[:, :a_dim]


def anet_reference_f32(x, p):
    h1 = jnp.maximum(x @ p["w1"] + p["b1"], 0.0)
    h2 = jnp.maximum(h1 @ p["w2"] + p["b2"], 0.0)
    return jnp.tanh(h2 @ p["w3"] + p["b3"]) * 2.0


# --------------------------------------------------------------------------
if __name__ == "__main__":
    key = jax.random.PRNGKey(0)
    k_param, k_x, k_xb = jax.random.split(key, 3)

    # Pendulum-like dims: s_dim=3 (observation), a_dim=1 (action).
    s_dim, a_dim = 3, 1
    params = init_params(k_param, s_dim, a_dim)
    pp, s_dim_, a_dim_ = prepare_params(params)

    fwd_small = jax.jit(anet_forward, static_argnums=(2,))
    fwd_batch = jax.jit(anet_forward_batched, static_argnums=(2, 3))

    # ---- Latency path: single control step, batch=2 -----------------------
    batch = 2
    x = jax.random.normal(k_x, (batch, s_dim), jnp.float32)
    out = jax.block_until_ready(fwd_small(x, pp, a_dim_))
    assert out.shape == (batch, a_dim)

    ref_bf16 = anet_reference_bf16(x, pp, a_dim_)
    assert jnp.allclose(out, ref_bf16, atol=2e-3, rtol=2e-3), (out, ref_bf16)

    ref_f32 = anet_reference_f32(x, params)
    assert jnp.allclose(out, ref_f32, atol=1e-1, rtol=1e-1), (out, ref_f32)

    # ---- Throughput path: batched grid (weights DMA'd once per call) ------
    big_batch = 300                       # deliberately not a multiple of 128
    xb = jax.random.normal(k_xb, (big_batch, s_dim), jnp.float32)
    outb = jax.block_until_ready(fwd_batch(xb, pp, a_dim_, 128))
    assert outb.shape == (big_batch, a_dim)

    refb = anet_reference_bf16(xb, pp, a_dim_)
    assert jnp.allclose(outb, refb, atol=5e-3, rtol=5e-3), (
        float(jnp.max(jnp.abs(outb - refb))))

    # Both paths must agree with each other on identical inputs.
    out_via_batch = jax.block_until_ready(fwd_batch(x, pp, a_dim_, 128))
    assert jnp.allclose(out, out_via_batch, atol=5e-3, rtol=5e-3)

    print("KERNEL_OK")
</pallas_src>

<mosaic_0001>
module attributes {stable_mosaic.version = 11 : i64} {
  func.func @anet_kernel(%arg0: memref<8x8xf32, #tpu.memory_space<vmem>>, %arg1: memref<8x512xbf16, #tpu.memory_space<vmem>>, %arg2: memref<1x512xf32, #tpu.memory_space<vmem>>, %arg3: memref<512x384xbf16, #tpu.memory_space<vmem>>, %arg4: memref<1x384xf32, #tpu.memory_space<vmem>>, %arg5: memref<384x128xbf16, #tpu.memory_space<vmem>>, %arg6: memref<1x128xf32, #tpu.memory_space<vmem>>, %arg7: memref<8x128xf32, #tpu.memory_space<vmem>>) attributes {dimension_semantics = [], scalar_prefetch = 0 : i64, scratch_operands = 0 : i64, tpu.core_type = #tpu.core_type<tc>} {
    %c0 = arith.constant 0 : index
    %c0_0 = arith.constant 0 : index
    %0 = vector.load %arg0[%c0, %c0_0] : memref<8x8xf32, #tpu.memory_space<vmem>>, vector<8x8xf32>
    %1 = arith.truncf %0 : vector<8x8xf32> to vector<8x8xbf16>
    %c0_1 = arith.constant 0 : index
    %c0_2 = arith.constant 0 : index
    %2 = vector.load %arg1[%c0_1, %c0_2] : memref<8x512xbf16, #tpu.memory_space<vmem>>, vector<8x512xbf16>
    %cst = arith.constant dense<0.000000e+00> : vector<8x512xf32>
    %3 = tpu.matmul %1, %2, %cst {dimension_numbers = #tpu.dot_dimension_numbers<[1], [0], [0], [1], [0, 0, 1, 1], [], []>} : vector<8x8xbf16>, vector<8x512xbf16>, vector<8x512xf32> -> vector<8x512xf32>
    %c0_3 = arith.constant 0 : index
    %c0_4 = arith.constant 0 : index
    %4 = vector.load %arg2[%c0_3, %c0_4] : memref<1x512xf32, #tpu.memory_space<vmem>>, vector<1x512xf32>
    %5 = vector.broadcast %4 : vector<1x512xf32> to vector<8x512xf32>
    %6 = arith.addf %3, %5 : vector<8x512xf32>
    %cst_5 = arith.constant 0.000000e+00 : f32
    %7 = vector.broadcast %cst_5 : f32 to vector<8x512xf32>
    %8 = arith.maximumf %6, %7 : vector<8x512xf32>
    %9 = arith.truncf %8 : vector<8x512xf32> to vector<8x512xbf16>
    %c0_6 = arith.constant 0 : index
    %c0_7 = arith.constant 0 : index
    %10 = vector.load %arg3[%c0_6, %c0_7] : memref<512x384xbf16, #tpu.memory_space<vmem>>, vector<512x384xbf16>
    %cst_8 = arith.constant dense<0.000000e+00> : vector<8x384xf32>
    %11 = tpu.matmul %9, %10, %cst_8 {dimension_numbers = #tpu.dot_dimension_numbers<[1], [0], [0], [1], [0, 0, 1, 1], [], []>} : vector<8x512xbf16>, vector<512x384xbf16>, vector<8x384xf32> -> vector<8x384xf32>
    %c0_9 = arith.constant 0 : index
    %c0_10 = arith.constant 0 : index
    %12 = vector.load %arg4[%c0_9, %c0_10] : memref<1x384xf32, #tpu.memory_space<vmem>>, vector<1x384xf32>
    %13 = vector.broadcast %12 : vector<1x384xf32> to vector<8x384xf32>
    %14 = arith.addf %11, %13 : vector<8x384xf32>
    %cst_11 = arith.constant 0.000000e+00 : f32
    %15 = vector.broadcast %cst_11 : f32 to vector<8x384xf32>
    %16 = arith.maximumf %14, %15 : vector<8x384xf32>
    %17 = arith.truncf %16 : vector<8x384xf32> to vector<8x384xbf16>
    %c0_12 = arith.constant 0 : index
    %c0_13 = arith.constant 0 : index
    %18 = vector.load %arg5[%c0_12, %c0_13] : memref<384x128xbf16, #tpu.memory_space<vmem>>, vector<384x128xbf16>
    %cst_14 = arith.constant dense<0.000000e+00> : vector<8x128xf32>
    %19 = tpu.matmul %17, %18, %cst_14 {dimension_numbers = #tpu.dot_dimension_numbers<[1], [0], [0], [1], [0, 0, 1, 1], [], []>} : vector<8x384xbf16>, vector<384x128xbf16>, vector<8x128xf32> -> vector<8x128xf32>
    %c0_15 = arith.constant 0 : index
    %c0_16 = arith.constant 0 : index
    %20 = vector.load %arg6[%c0_15, %c0_16] : memref<1x128xf32, #tpu.memory_space<vmem>>, vector<1x128xf32>
    %21 = vector.broadcast %20 : vector<1x128xf32> to vector<8x128xf32>
    %22 = arith.addf %19, %21 : vector<8x128xf32>
    %23 = math.tanh %22 : vector<8x128xf32>
    %cst_17 = arith.constant 2.000000e+00 : f32
    %24 = vector.broadcast %cst_17 : f32 to vector<8x128xf32>
    %25 = arith.mulf %23, %24 : vector<8x128xf32>
    %c0_18 = arith.constant 0 : index
    %c0_19 = arith.constant 0 : index
    %26 = vector.load %arg7[%c0_18, %c0_19] : memref<8x128xf32, #tpu.memory_space<vmem>>, vector<8x128xf32>
    tpu.vector_store %arg7[%c0_18, %c0_19], %25 {strides = array<i32>} : memref<8x128xf32, #tpu.memory_space<vmem>>, vector<8x128xf32>,
    return
  }
}

</mosaic_0001>

<bundles_post_ra>
// kernel: anet_forward.1
= control target key start
LH: loop header
LB: loop body
LE: loop exit
PB: predicated region body
PF: predicated region fallthrough
CT: control target
= control target key end

     0   :  { %12 = vsyncpa [#allocation3], 0  ;;  %s1877_s0 = inlined_call_operand.vmem [shape: f32[8,8], index: 0, kind: input, shape index: {}]   ;;  %s1878_s1 = inlined_call_operand.vmem [shape: bf16[8,512], index: 1, kind: input, shape index: {}]   ;;  %s1879_s2 = inlined_call_operand.vmem [shape: f32[1,512], index: 2, kind: input, shape index: {}]   ;;  %s1880_s3 = inlined_call_operand.hbm [shape: bf16[512,384], index: 3, kind: input, shape index: {}]   ;;  %s1881_s4 = inlined_call_operand.vmem [shape: f32[1,384], index: 4, kind: input, shape index: {}]   ;;  %s1882_s5 = inlined_call_operand.hbm [shape: bf16[384,128], index: 5, kind: input, shape index: {}]   ;;  %s1883_s6 = inlined_call_operand.vmem [shape: f32[1,128], index: 6, kind: input, shape index: {}]   ;;  %s1884_s7 = inlined_call_operand.vmem [shape: f32[8,128], index: 7, kind: output, shape index: {}]  }
   0x1   :  { %13 = vsyncpa [#allocation5], 0  ;;  %s1756_s24 = smov [#allocation2]   ;;  %s1708_s28 = scalar_lea.hbm %s1880_s3, 12288 }
   0x2   :  { %s25_s25 = sshll.u32 %s1756_s24, 4  ;;  %p1709_p0 = scmp.ne.s32.totalorder %s1880_s3, %s1708_s28  ;;  %s26_s25 = int_to_ptr.vmem [resolvable:$true] %s25_s25 }
   0x3   :  { %p1712_p1 = scmp.lt.u32.totalorder %s1708_s28, %s1880_s3 }
   0x5   :  { %p1714_p2 = pnand %p1712_p1, %p1709_p0 }
   0x7   :  { %1717 = shalt.err (!%p1714_p2)
}
   0x8   :  { %s1718_s10 = scalar_lea.vmem %s26_s25, 12288  ;;  %p1723_p4 = scmp.lt.s32.totalorder %s26_s25, %s26_s25 }
   0x9   :  { %p1719_p3 = scmp.ne.s32.totalorder %s26_s25, %s1718_s10  ;;  %p1724_p5 = scmp.lt.s32.totalorder %s1718_s10, %s1718_s10 }
   0xb   :  { %p1725_p6 = por %p1724_p5, %p1723_p4 }
   0xd   :  { %p1726_p7 = pnand %p1725_p6, %p1719_p3 }
   0xf   :  { %1729 = shalt.err (!%p1726_p7)
}
  0x10   :  { %s1757_s11 = smov 192   ;;  %s1758_s12 = smov 12  }
  0x11   :  { %31 = dma.hbm_to_vmem [thread:$0]  %s1880_s3, 12288, %s26_s25, [#allocation3], %s1757_s11, %s1757_s11, %s1758_s12  }
  0x12   :  { %s1759_s15 = smov [#allocation4]   ;;  %s1730_s19 = scalar_lea.hbm %s1882_s5, 3072 }
  0x13   :  { %s39_s16 = sshll.u32 %s1759_s15, 4  ;;  %p1731_p8 = scmp.ne.s32.totalorder %s1882_s5, %s1730_s19  ;;  %s40_s16 = int_to_ptr.vmem [resolvable:$true] %s39_s16 }
  0x14   :  { %p1734_p9 = scmp.lt.u32.totalorder %s1730_s19, %s1882_s5 }
  0x16   :  { %p1736_p10 = pnand %p1734_p9, %p1731_p8 }
  0x18   :  { %1739 = shalt.err (!%p1736_p10)
}
  0x19   :  { %s1740_s24 = scalar_lea.vmem %s40_s16, 3072  ;;  %p1745_p12 = scmp.lt.s32.totalorder %s40_s16, %s40_s16 }
  0x1a   :  { %p1741_p11 = scmp.ne.s32.totalorder %s40_s16, %s1740_s24  ;;  %p1746_p13 = scmp.lt.s32.totalorder %s1740_s24, %s1740_s24 }
  0x1c   :  { %p1747_p0 = por %p1746_p13, %p1745_p12 }
  0x1e   :  { %p1748_p1 = pnand %p1747_p0, %p1741_p11 }
  0x20   :  { %1751 = shalt.err (!%p1748_p1)
}
  0x21   :  { %s1760_s3 = smov 64   ;;  %s1761_s25 = smov 4  }
  0x22   :  { %45 = dma.hbm_to_vmem [thread:$0]  %s1882_s5, 3072, %s40_s16, [#allocation5], %s1760_s3, %s1760_s3, %s1761_s25  }
  0x23   :  { %1752 = dma.done.wait [#allocation3], 12288  }
  0x24   :  { %1753 = vsyncadd [#allocation3], 4294955008 }
  0x25   :  { %1754 = dma.done.wait [#allocation5], 3072  }
  0x26   :  { %1755 = vsyncadd [#allocation5], 4294964224  ;;  %v1762_v0 = vmov 0   ;;  %v57_v1 = vld [vmem:[%s1878_s1] sm:$0xff]  ;;  %vm95_vm0 = vcmask 1043456   ;;  %v58_v3 = vld [vmem:[%s1878_s1 + $0x8] sm:$0xff]  ;;  %v61_v61 = vlaneseq }
  0x27   :  { %140 = vmatprep.mubr.bf16.mxu0 %v1762_v0  ;;  %181 = vmatprep.mubr.bf16.mxu1 %v1762_v0  ;;  %v55_v2 = vld [vmem:[%s1877_s0] sm:$0xff]  ;;  %v1312_v4 = vcombine.high %v57_v1, %v57_v1  ;;  %v1311_v5 = vcombine.low %v57_v1, %v57_v1  ;;  %v1314_v6 = vcombine.high %v58_v3, %v58_v3  ;;  %vm91_vm1 = vcmask 64512   ;;  %v1554_v12 = vld [vmem:[#allocation2] ss:$12 sps:$4 sm:$0xff]   ;;  %v1559_v13 = vld [vmem:[#allocation2 + $0x1c] ss:$12 sps:$4 sm:$0xff]  }
  0x28   :  { %v1313_v7 = vcombine.low %v58_v3, %v58_v3  ;;  %v1556_v8 = vld [vmem:[#allocation2 + $0x4] ss:$12 sps:$4 sm:$0xff]   ;;  %v56_v10 = vpack.c.bf16 %v55_v2, %v55_v2  ;;  %v1562_v15 = vld [vmem:[#allocation2 + $0x34] ss:$12 sps:$4 sm:$0xff]   ;;  %v1565_v17 = vld [vmem:[#allocation2 + $0x4c] ss:$12 sps:$4 sm:$0xff]  }
  0x29   :  { %1315 = vmatprep.subr.msk.bf16.mxu0 %vm95_vm0, %v1312_v4  ;;  %v97_v9 = vsel %vm95_vm0, %v1311_v5, 0  ;;  %1317 = vmatprep.subr.msk.bf16.mxu1 %vm95_vm0, %v1314_v6  ;;  %v1557_v14 = vld [vmem:[#allocation2 + $0x18] ss:$12 sps:$4 sm:$0xff]   ;;  %v1560_v16 = vld [vmem:[#allocation2 + $0x30] ss:$12 sps:$4 sm:$0xff]   ;;  %v1838_v62 = vshrl.u32 %v61_v61, 7 }
  0x2a   :  { %109 = vmatpush1.bf16.msra.mxu0 %v97_v9  ;;  %v103_v11 = vsel %vm95_vm0, %v1313_v7, 0  ;;  %v1581_v18 = vld [vmem:[#allocation2 + $0xc8] ss:$12 sps:$4 sm:$0xff]   ;;  %v1568_v21 = vld [vmem:[#allocation2 + $0x64] ss:$12 sps:$4 sm:$0xff]   ;;  %vm1764_vm2 = vmmov 0  }
  0x2b   :  { %150 = vmatpush1.bf16.msra.mxu1 %v103_v11  ;;  %855 = vmatprep.subr.bf16.mxu0 %v1556_v8  ;;  %v1582_v19 = vld [vmem:[#allocation2 + $0x8] ss:$12 sps:$4 sm:$0xff]   ;;  %v1586_v22 = vld [vmem:[#allocation2 + $0xe0] ss:$12 sps:$4 sm:$0xff]   ;;  %v1591_v26 = vld [vmem:[#allocation2 + $0xf8] ss:$12 sps:$4 sm:$0xff]  }
  0x2c   :  { %v1563_v20 = vld [vmem:[#allocation2 + $0x48] ss:$12 sps:$4 sm:$0xff]   ;;  %1440 = vmatprep.subr.bf16.mxu1 %v1581_v18  ;;  %v1587_v23 = vld [vmem:[#allocation2 + $0x20] ss:$12 sps:$4 sm:$0xff]   ;;  %v1592_v27 = vld [vmem:[#allocation2 + $0x38] ss:$12 sps:$4 sm:$0xff]  }
  0x2d   :  { %1316 = vmatmul.mubr.msk.bf16.vlgmr.msra.gmra.mrb[0].mxu0 %vm91_vm1, %v56_v10  ;;  %v1566_v24 = vld [vmem:[#allocation2 + $0x60] ss:$12 sps:$4 sm:$0xff]   ;;  %v1571_v25 = vld [vmem:[#allocation2 + $0x7c] ss:$12 sps:$4 sm:$0xff]   ;;  %v1569_v28 = vld [vmem:[#allocation2 + $0x78] ss:$12 sps:$4 sm:$0xff]  }
  0x2e   :  { %1318 = vmatmul.mubr.msk.bf16.vlgmr.msra.gmra.mrb[0].mxu1 %vm91_vm1, %v56_v10  ;;  %856 = vmatpush1.bf16.msra.mxu0 %v1554_v12  ;;  %v1596_v29 = vld [vmem:[#allocation2 + $0x110] ss:$12 sps:$4 sm:$0xff]   ;;  %v1574_v31 = vld [vmem:[#allocation2 + $0x94] ss:$12 sps:$4 sm:$0xff]   ;;  %v1577_v35 = vld [vmem:[#allocation2 + $0xac] ss:$12 sps:$4 sm:$0xff]  }
  0x2f   :  { %857 = vmatprep.subr.bf16.mxu0 %v1559_v13  ;;  %1441 = vmatpush3.bf16.msra.mxu1 %v1582_v19  ;;  %v1597_v30 = vld [vmem:[#allocation2 + $0x50] ss:$12 sps:$4 sm:$0xff]   ;;  %v1601_v33 = vld [vmem:[#allocation2 + $0x128] ss:$12 sps:$4 sm:$0xff]   ;;  %v1606_v37 = vld [vmem:[#allocation2 + $0x140] ss:$12 sps:$4 sm:$0xff]  }
  0x30   :  { %1442 = vmatprep.subr.bf16.mxu1 %v1586_v22  ;;  %v1572_v32 = vld [vmem:[#allocation2 + $0x90] ss:$12 sps:$4 sm:$0xff]   ;;  %v1602_v34 = vld [vmem:[#allocation2 + $0x68] ss:$12 sps:$4 sm:$0xff]   ;;  %v1607_v39 = vld [vmem:[#allocation2 + $0x80] ss:$12 sps:$4 sm:$0xff]  }
  0x31   :  { %v1575_v36 = vld [vmem:[#allocation2 + $0xa8] ss:$12 sps:$4 sm:$0xff]   ;;  %v1580_v38 = vld [vmem:[#allocation2 + $0xc4] ss:$12 sps:$4 sm:$0xff]   ;;  %v1578_v40 = vld [vmem:[#allocation2 + $0xc0] ss:$12 sps:$4 sm:$0xff]  }
  0x32   :  { %858 = vmatpush1.bf16.msra.mxu0 %v1557_v14  ;;  %v1585_v41 = vld [vmem:[#allocation2 + $0xdc] ss:$12 sps:$4 sm:$0xff]   ;;  %v1583_v42 = vld [vmem:[#allocation2 + $0xd8] ss:$12 sps:$4 sm:$0xff]   ;;  %v1590_v43 = vld [vmem:[#allocation2 + $0xf4] ss:$12 sps:$4 sm:$0xff]  }
  0x33   :  { %859 = vmatprep.subr.bf16.mxu0 %v1562_v15  ;;  %1443 = vmatpush3.bf16.msra.mxu1 %v1587_v23  ;;  %v1588_v44 = vld [vmem:[#allocation2 + $0xf0] ss:$12 sps:$4 sm:$0xff]   ;;  %v1595_v45 = vld [vmem:[#allocation2 + $0x10c] ss:$12 sps:$4 sm:$0xff]   ;;  %v1593_v46 = vld [vmem:[#allocation2 + $0x108] ss:$12 sps:$4 sm:$0xff]  }
  0x34   :  { %1444 = vmatprep.subr.bf16.mxu1 %v1591_v26  ;;  %v1600_v47 = vld [vmem:[#allocation2 + $0x124] ss:$12 sps:$4 sm:$0xff]   ;;  %v1598_v48 = vld [vmem:[#allocation2 + $0x120] ss:$12 sps:$4 sm:$0xff]   ;;  %v1605_v49 = vld [vmem:[#allocation2 + $0x13c] ss:$12 sps:$4 sm:$0xff]  }
  0x35   :  { %v1603_v50 = vld [vmem:[#allocation2 + $0x138] ss:$12 sps:$4 sm:$0xff]   ;;  %v1610_v51 = vld [vmem:[#allocation2 + $0x154] ss:$12 sps:$4 sm:$0xff]   ;;  %v1608_v53 = vld [vmem:[#allocation2 + $0x150] ss:$12 sps:$4 sm:$0xff]  }
  0x36   :  { %860 = vmatpush1.bf16.msra.mxu0 %v1560_v16  ;;  %v1611_v52 = vld [vmem:[#allocation2 + $0x158] ss:$12 sps:$4 sm:$0xff]   ;;  %v1616_v56 = vld [vmem:[#allocation2 + $0x170] ss:$12 sps:$4 sm:$0xff]   ;;  %v1613_v57 = vld [vmem:[#allocation2 + $0x168] ss:$12 sps:$4 sm:$0xff]  }
  0x37   :  { %861 = vmatprep.subr.bf16.mxu0 %v1565_v17  ;;  %1445 = vmatpush3.bf16.msra.mxu1 %v1592_v27  ;;  %v1612_v54 = vld [vmem:[#allocation2 + $0x98] ss:$12 sps:$4 sm:$0xff]   ;;  %v1617_v58 = vld [vmem:[#allocation2 + $0xb0] ss:$12 sps:$4 sm:$0xff]   ;;  %v1621_v60 = vld [vmem:[#allocation2 + $0x248] ss:$12 sps:$4 sm:$0xff]  }
  0x38   :  { %1446 = vmatprep.subr.bf16.mxu1 %v1596_v29  ;;  %v1615_v55 = vld [vmem:[#allocation2 + $0x16c] ss:$12 sps:$4 sm:$0xff]   ;;  %v1620_v59 = vld [vmem:[#allocation2 + $0x184] ss:$12 sps:$4 sm:$0xff]   ;;  %v63_v63 = vsub.s32 0, %v1838_v62  ;;  %v67_v1 = vsub.s32 1, %v1838_v62 }
  0x39   :  { %v1844_v0 = vld [vmem:[%s1879_s2] sm:$0xf]  ;;  %v75_v2 = vsub.s32 3, %v1838_v62  ;;  %v1622_v22 = vld [vmem:[#allocation2 + $0x188] ss:$12 sps:$4 sm:$0xff]  }
  0x3a   :  { %862 = vmatpush1.bf16.msra.mxu0 %v1563_v20  ;;  %v64_v3 = vrot.slane %v1844_v0, %v63_v63  ;;  %v68_v4 = vrot.slane %v1844_v0, %v67_v1  ;;  %v1623_v27 = vld [vmem:[#allocation2 + $0x198] ss:$12 sps:$4 sm:$0xff]   ;;  %v1630_v29 = vld [vmem:[#allocation2 + $0x1b4] ss:$12 sps:$4 sm:$0xff]  }
  0x3b   :  { %863 = vmatprep.subr.bf16.mxu0 %v1568_v21  ;;  %1447 = vmatpush3.bf16.msra.mxu1 %v1597_v30  ;;  %v76_v5 = vrot.slane %v1844_v0, %v75_v2  ;;  %v1618_v21 = vld [vmem:[#allocation2 + $0x180] ss:$12 sps:$4 sm:$0xff]   ;;  %v1631_v30 = vld [vmem:[#allocation2 + $0x278] ss:$12 sps:$4 sm:$0xff]   ;;  %v1664_v2 = vld [vmem:[#allocation2 + $0x270] ss:$12 sps:$4 sm:$0xff]  }
  0x3c   :  { %1448 = vmatprep.subr.bf16.mxu1 %v1601_v33  ;;  %v1635_v33 = vld [vmem:[#allocation2 + $0x1cc] ss:$12 sps:$4 sm:$0xff]  }
  0x3d   :  { %v1661_v61 = vld [vmem:[#allocation2 + $0x258] ss:$12 sps:$4 sm:$0xff]  }
  0x3e   :  { %864 = vmatpush1.bf16.msra.mxu0 %v1566_v24  ;;  %v1625_v24 = vld [vmem:[#allocation2 + $0x19c] ss:$12 sps:$4 sm:$0xff]  }
  0x3f   :  { %865 = vmatprep.subr.bf16.mxu0 %v1571_v25  ;;  %1449 = vmatpush3.bf16.msra.mxu1 %v1602_v34  ;;  %v1626_v25 = vld [vmem:[#allocation2 + $0x260] ss:$12 sps:$4 sm:$0xff]   ;;  %v1636_v34 = vld [vmem:[#allocation2 + $0x290] ss:$12 sps:$4 sm:$0xff]  }
  0x40   :  { %1450 = vmatprep.subr.bf16.mxu1 %v1606_v37  ;;  %v1640_v37 = vld [vmem:[#allocation2 + $0x1e4] ss:$12 sps:$4 sm:$0xff]  }
  0x42   :  { %866 = vmatpush1.bf16.msra.mxu0 %v1569_v28  ;;  %v1627_v28 = vld [vmem:[#allocation2 + $0x1a0] ss:$12 sps:$4 sm:$0xff]  }
  0x43   :  { %867 = vmatprep.subr.bf16.mxu0 %v1574_v31  ;;  %1451 = vmatpush3.bf16.msra.mxu1 %v1607_v39  ;;  %v1628_v31 = vld [vmem:[#allocation2 + $0x1b0] ss:$12 sps:$4 sm:$0xff]   ;;  %v71_v39 = vsub.s32 2, %v1838_v62 }
  0x44   :  { %1452 = vmatprep.subr.bf16.mxu1 %v1611_v52  ;;  %v1655_v52 = vld [vmem:[#allocation2 + $0x22c] ss:$12 sps:$4 sm:$0xff]   ;;  %v1700_v62 = vld [vmem:[#allocation4 + $0x90] sm:$0xff]  }
  0x46   :  { %868 = vmatpush1.bf16.msra.mxu0 %v1572_v32  ;;  %v1632_v32 = vld [vmem:[#allocation2 + $0x1b8] ss:$12 sps:$4 sm:$0xff]  }
  0x47   :  { %869 = vmatprep.subr.bf16.mxu0 %v1577_v35  ;;  %1453 = vmatpush3.bf16.msra.mxu1 %v1612_v54  ;;  %v1633_v35 = vld [vmem:[#allocation2 + $0x1c8] ss:$12 sps:$4 sm:$0xff]  }
  0x48   :  { %1454 = vmatprep.subr.bf16.mxu1 %v1616_v56  ;;  %v1657_v56 = vld [vmem:[#allocation2 + $0x230] ss:$12 sps:$4 sm:$0xff]  }
  0x4a   :  { %870 = vmatpush1.bf16.msra.mxu0 %v1575_v36  ;;  %v1637_v36 = vld [vmem:[#allocation2 + $0x1d0] ss:$12 sps:$4 sm:$0xff]  }
  0x4b   :  { %871 = vmatprep.subr.bf16.mxu0 %v1580_v38  ;;  %1455 = vmatpush3.bf16.msra.mxu1 %v1617_v58  ;;  %v1641_v38 = vld [vmem:[#allocation2 + $0x2a8] ss:$12 sps:$4 sm:$0xff]  }
  0x4c   :  { %1462 = vmatprep.subr.bf16.mxu1 %v1621_v60  ;;  %v1663_v60 = vld [vmem:[#allocation2 + $0x25c] ss:$12 sps:$4 sm:$0xff]  }
  0x4e   :  { %872 = vmatpush1.bf16.msra.mxu0 %v1578_v40  ;;  %v1638_v40 = vld [vmem:[#allocation2 + $0x1e0] ss:$12 sps:$4 sm:$0xff]  }
  0x4f   :  { %873 = vmatprep.subr.bf16.mxu0 %v1585_v41  ;;  %v1642_v41 = vld [vmem:[#allocation2 + $0x1e8] ss:$12 sps:$4 sm:$0xff]  }
  0x52   :  { %874 = vmatpush1.bf16.msra.mxu0 %v1583_v42  ;;  %v1645_v42 = vld [vmem:[#allocation2 + $0x1fc] ss:$12 sps:$4 sm:$0xff]  }
  0x53   :  { %875 = vmatprep.subr.bf16.mxu0 %v1590_v43  ;;  %v1646_v43 = vld [vmem:[#allocation2 + $0x2c0] ss:$12 sps:$4 sm:$0xff]  }
  0x56   :  { %876 = vmatpush1.bf16.msra.mxu0 %v1588_v44  ;;  %v72_v44 = vrot.slane %v1844_v0, %v71_v39  ;;  %v1666_v0 = vld [vmem:[#allocation2 + $0x274] ss:$12 sps:$4 sm:$0xff]  }
  0x57   :  { %877 = vmatprep.subr.bf16.mxu0 %v1595_v45  ;;  %v1643_v45 = vld [vmem:[#allocation2 + $0x1f8] ss:$12 sps:$4 sm:$0xff]  }
  0x5a   :  { %878 = vmatpush1.bf16.msra.mxu0 %v1593_v46  ;;  %v1647_v46 = vld [vmem:[#allocation2 + $0x200] ss:$12 sps:$4 sm:$0xff]  }
  0x5b   :  { %879 = vmatprep.subr.bf16.mxu0 %v1600_v47  ;;  %v1650_v47 = vld [vmem:[#allocation2 + $0x214] ss:$12 sps:$4 sm:$0xff]  }
  0x5e   :  { %880 = vmatpush1.bf16.msra.mxu0 %v1598_v48  ;;  %v1651_v48 = vld [vmem:[#allocation2 + $0x2d8] ss:$12 sps:$4 sm:$0xff]  }
  0x5f   :  { %881 = vmatprep.subr.bf16.mxu0 %v1605_v49 }
  0x62   :  { %882 = vmatpush1.bf16.msra.mxu0 %v1603_v50  ;;  %v1648_v50 = vld [vmem:[#allocation2 + $0x210] ss:$12 sps:$4 sm:$0xff]  }
  0x63   :  { %883 = vmatprep.subr.bf16.mxu0 %v1610_v51  ;;  %v1652_v51 = vld [vmem:[#allocation2 + $0x218] ss:$12 sps:$4 sm:$0xff]  }
  0x66   :  { %884 = vmatpush1.bf16.msra.mxu0 %v1608_v53  ;;  %v1656_v53 = vld [vmem:[#allocation2 + $0x2f0] ss:$12 sps:$4 sm:$0xff]  }
  0x67   :  { %885 = vmatprep.subr.bf16.mxu0 %v1615_v55  ;;  %v1653_v55 = vld [vmem:[#allocation2 + $0x228] ss:$12 sps:$4 sm:$0xff]  }
  0x6a   :  { %886 = vmatpush1.bf16.msra.mxu0 %v1613_v57  ;;  %v1660_v57 = vld [vmem:[#allocation2 + $0x244] ss:$12 sps:$4 sm:$0xff]  }
  0x6b   :  { %896 = vmatprep.subr.bf16.mxu0 %v1620_v59  ;;  %v1658_v59 = vld [vmem:[#allocation2 + $0x240] ss:$12 sps:$4 sm:$0xff]  }
 0x100   :  { %v142_v6 = vpop.f32.mrb[0].mxu0 }
 0x101   :  { %v143_v7 = vadd.f32 %v142_v6, %v64_v3  ;;  %v144_v8 = vpop.f32.mrb[1].mxu0  ;;  %v1855_v9 = vpop.f32.mrb[0].mxu1  ;;  %v1669_v3 = vld [vmem:[#allocation2 + $0x28c] ss:$12 sps:$4 sm:$0xff]  }
 0x102   :  { %v145_v10 = vadd.f32 %v144_v8, %v68_v4  ;;  %v146_v11 = vpop.f32.mrb[2].mxu0  ;;  %v185_v12 = vpop.f32.mrb[1].mxu1  ;;  %v184_v49 = vadd.f32 %v1855_v9, %v72_v44  ;;  %v1667_v4 = vld [vmem:[#allocation2 + $0x288] ss:$12 sps:$4 sm:$0xff]   ;;  %v1670_v6 = vld [vmem:[#allocation2 + $0x2a0] ss:$12 sps:$4 sm:$0xff]  }
 0x103   :  { %v190_v13 = vmax.f32 %v143_v7, 0.0  ;;  %v147_v14 = vpop.f32.mrb[3].mxu0  ;;  %v186_v15 = vadd.f32 %v185_v12, %v76_v5  ;;  %v187_v16 = vpop.f32.mrb[2].mxu1  ;;  %v1672_v5 = vld [vmem:[#allocation2 + $0x2a4] ss:$12 sps:$4 sm:$0xff]  }
 0x104   :  { %v191_v17 = vmax.f32 %v145_v10, 0.0  ;;  %v188_v18 = vpop.f32.mrb[3].mxu1  ;;  %v192_v54 = vmax.f32 %v184_v49, 0.0  ;;  %v1675_v7 = vld [vmem:[#allocation2 + $0x2bc] ss:$12 sps:$4 sm:$0xff]   ;;  %v1683_v14 = vld [vmem:[#allocation4] sm:$0xff]  }
 0x105   :  { %v193_v19 = vmax.f32 %v186_v15, 0.0  ;;  %v194_v23 = vpack.c.bf16 %v190_v13, %v190_v13  ;;  %v1673_v8 = vld [vmem:[#allocation2 + $0x2b8] ss:$12 sps:$4 sm:$0xff]   ;;  %v1678_v9 = vld [vmem:[#allocation2 + $0x2d4] ss:$12 sps:$4 sm:$0xff]   ;;  %v1684_v15 = vld [vmem:[#allocation4 + $0x48] sm:$0xff]  }
 0x106   :  { %v195_v20 = vpack.c.bf16 %v191_v17, %v191_v17  ;;  %v196_v58 = vpack.c.bf16 %v192_v54, %v192_v54  ;;  %v1676_v10 = vld [vmem:[#allocation2 + $0x2d0] ss:$12 sps:$4 sm:$0xff]   ;;  %v1681_v11 = vld [vmem:[#allocation2 + $0x2ec] ss:$12 sps:$4 sm:$0xff]   ;;  %v1679_v12 = vld [vmem:[#allocation2 + $0x2e8] ss:$12 sps:$4 sm:$0xff]  }
 0x107   :  { %v197_v26 = vpack.c.bf16 %v193_v19, %v193_v19  ;;  %v1682_v13 = vld [vmem:[#allocation4 + $0x40] sm:$0xff]   ;;  %v1685_v16 = vld [vmem:[#allocation4 + $0x8] sm:$0xff]   ;;  %v1686_v17 = vld [vmem:[#allocation4 + $0x50] sm:$0xff]  }
 0x108   :  { %887 = vmatprep.mubr.bf16.mxu0 %v195_v20  ;;  %969 = vmatprep.mubr.bf16.mxu1 %v195_v20  ;;  %v1687_v18 = vld [vmem:[#allocation4 + $0x10] sm:$0xff]   ;;  %v1688_v19 = vld [vmem:[#allocation4 + $0x58] sm:$0xff]  }
 0x109   :  { %888 = vmatmul.mubr.bf16.vlgmr.msra.gmra.mrb[4].mxu0 %v194_v23  ;;  %970 = vmatmul.mubr.bf16.vlgmr.msra.gmra.mrb[4].mxu1 %v194_v23  ;;  %v1689_v20 = vld [vmem:[#allocation4 + $0x18] sm:$0xff]   ;;  %v1692_v23 = vld [vmem:[#allocation4 + $0x68] sm:$0xff]  }
 0x10a   :  { %897 = vmatpush1.bf16.msra.mxu0 %v1618_v21  ;;  %1463 = vmatpush3.bf16.msra.mxu1 %v1622_v22  ;;  %v1690_v21 = vld [vmem:[#allocation4 + $0x60] sm:$0xff]  }
 0x10b   :  { %898 = vmatprep.subr.bf16.mxu0 %v1625_v24  ;;  %1464 = vmatprep.subr.bf16.mxu1 %v1626_v25  ;;  %v1691_v22 = vld [vmem:[#allocation4 + $0x20] sm:$0xff]   ;;  %v1693_v24 = vld [vmem:[#allocation4 + $0x28] sm:$0xff]   ;;  %v1694_v25 = vld [vmem:[#allocation4 + $0x70] sm:$0xff]  }
 0x10c   :  { %1009 = vmatprep.mubr.bf16.mxu1 %v197_v26  ;;  %928 = vmatprep.mubr.bf16.mxu0 %v197_v26  ;;  %v1695_v26 = vld [vmem:[#allocation4 + $0x30] sm:$0xff]  }
 0x10e   :  { %899 = vmatpush1.bf16.msra.mxu0 %v1623_v27  ;;  %1465 = vmatpush3.bf16.msra.mxu1 %v1627_v28  ;;  %v1696_v27 = vld [vmem:[#allocation4 + $0x78] sm:$0xff]  }
 0x10f   :  { %900 = vmatprep.subr.bf16.mxu0 %v1630_v29  ;;  %1466 = vmatprep.subr.bf16.mxu1 %v1631_v30  ;;  %v1697_v28 = vld [vmem:[#allocation4 + $0x38] sm:$0xff]   ;;  %v1763_v29 = vmov 0.0  }
 0x112   :  { %901 = vmatpush1.bf16.msra.mxu0 %v1628_v31  ;;  %1467 = vmatpush3.bf16.msra.mxu1 %v1632_v32 }
 0x113   :  { %902 = vmatprep.subr.bf16.mxu0 %v1635_v33  ;;  %1468 = vmatprep.subr.bf16.mxu1 %v1636_v34 }
 0x116   :  { %903 = vmatpush1.bf16.msra.mxu0 %v1633_v35  ;;  %1469 = vmatpush3.bf16.msra.mxu1 %v1637_v36  ;;  %v326_v35 = vld [vmem:[%s1881_s4] sm:$0x7] }
 0x117   :  { %904 = vmatprep.subr.bf16.mxu0 %v1640_v37  ;;  %1470 = vmatprep.subr.bf16.mxu1 %v1641_v38  ;;  %v339_v36 = vrot.slane %v326_v35, %v71_v39 }
 0x11a   :  { %905 = vmatpush1.bf16.msra.mxu0 %v1638_v40  ;;  %1471 = vmatpush3.bf16.msra.mxu1 %v1642_v41 }
 0x11b   :  { %906 = vmatprep.subr.bf16.mxu0 %v1645_v42  ;;  %1472 = vmatprep.subr.bf16.mxu1 %v1646_v43 }
 0x11e   :  { %907 = vmatpush1.bf16.msra.mxu0 %v1643_v45  ;;  %1473 = vmatpush3.bf16.msra.mxu1 %v1647_v46  ;;  %v331_v45 = vrot.slane %v326_v35, %v63_v63  ;;  %v335_v46 = vrot.slane %v326_v35, %v67_v1  ;;  %v1701_v63 = vld [vmem:[#allocation4 + $0x98] sm:$0xff]   ;;  %v1702_v1 = vld [vmem:[#allocation4 + $0xa0] sm:$0xff]  }
 0x11f   :  { %908 = vmatprep.subr.bf16.mxu0 %v1650_v47  ;;  %1474 = vmatprep.subr.bf16.mxu1 %v1651_v48 }
 0x122   :  { %909 = vmatpush1.bf16.msra.mxu0 %v1648_v50  ;;  %1475 = vmatpush3.bf16.msra.mxu1 %v1652_v51 }
 0x123   :  { %910 = vmatprep.subr.bf16.mxu0 %v1655_v52  ;;  %1476 = vmatprep.subr.bf16.mxu1 %v1656_v53 }
 0x126   :  { %911 = vmatpush1.bf16.msra.mxu0 %v1653_v55  ;;  %1477 = vmatpush3.bf16.msra.mxu1 %v1657_v56  ;;  %v1698_v55 = vld [vmem:[#allocation4 + $0x80] sm:$0xff]  }
 0x127   :  { %912 = vmatprep.subr.bf16.mxu0 %v1660_v57  ;;  %1484 = vmatprep.subr.bf16.mxu1 %v1682_v13  ;;  %v1699_v57 = vld [vmem:[#allocation4 + $0x88] sm:$0xff]  }
 0x129   :  { %1010 = vmatmul.mubr.bf16.vlgmr.msra.gmra.mrb[8].mxu1 %v196_v58 }
 0x12a   :  { %913 = vmatpush1.bf16.msra.mxu0 %v1658_v59  ;;  %1485 = vmatpush3.bf16.msra.mxu1 %v1683_v14  ;;  %v1704_v59 = vld [vmem:[#allocation4 + $0xb0] sm:$0xff]  }
 0x12b   :  { %914 = vmatprep.subr.bf16.mxu0 %v1663_v60  ;;  %1486 = vmatprep.subr.bf16.mxu1 %v1684_v15  ;;  %v1705_v60 = vld [vmem:[#allocation4 + $0xb8] sm:$0xff]  }
 0x12e   :  { %915 = vmatpush1.bf16.msra.mxu0 %v1661_v61  ;;  %1487 = vmatpush3.bf16.msra.mxu1 %v1685_v16 }
 0x12f   :  { %916 = vmatprep.subr.bf16.mxu0 %v1666_v0  ;;  %1488 = vmatprep.subr.bf16.mxu1 %v1686_v17 }
 0x132   :  { %917 = vmatpush1.bf16.msra.mxu0 %v1664_v2  ;;  %1489 = vmatpush3.bf16.msra.mxu1 %v1687_v18 }
 0x133   :  { %918 = vmatprep.subr.bf16.mxu0 %v1669_v3  ;;  %1490 = vmatprep.subr.bf16.mxu1 %v1688_v19 }
 0x136   :  { %919 = vmatpush1.bf16.msra.mxu0 %v1667_v4  ;;  %1491 = vmatpush3.bf16.msra.mxu1 %v1689_v20 }
 0x137   :  { %920 = vmatprep.subr.bf16.mxu0 %v1672_v5  ;;  %1492 = vmatprep.subr.bf16.mxu1 %v1690_v21 }
 0x13a   :  { %921 = vmatpush1.bf16.msra.mxu0 %v1670_v6  ;;  %1493 = vmatpush3.bf16.msra.mxu1 %v1691_v22 }
 0x13b   :  { %922 = vmatprep.subr.bf16.mxu0 %v1675_v7  ;;  %1494 = vmatprep.subr.bf16.mxu1 %v1692_v23  ;;  %v1415_v7 = vld [vmem:[%s1883_s6] ss:$0 sm:$0xff] }
 0x13e   :  { %923 = vmatpush1.bf16.msra.mxu0 %v1673_v8  ;;  %1495 = vmatpush3.bf16.msra.mxu1 %v1693_v24 }
 0x13f   :  { %924 = vmatprep.subr.bf16.mxu0 %v1678_v9  ;;  %1496 = vmatprep.subr.bf16.mxu1 %v1694_v25 }
 0x142   :  { %925 = vmatpush1.bf16.msra.mxu0 %v1676_v10  ;;  %1497 = vmatpush3.bf16.msra.mxu1 %v1695_v26 }
 0x143   :  { %926 = vmatprep.subr.bf16.mxu0 %v1681_v11  ;;  %1498 = vmatprep.subr.bf16.mxu1 %v1696_v27 }
 0x146   :  { %927 = vmatpush1.bf16.msra.mxu0 %v1679_v12  ;;  %1499 = vmatpush3.bf16.msra.mxu1 %v1697_v28 }
 0x147   :  { %1515 = vmatprep.subr.bf16.mxu1 %v1763_v29 }
 0x149   :  { %929 = vmatmul.mubr.bf16.vlgmr.msra.gmra.mrb[4].mxu0 %v196_v58  ;;  %v1703_v58 = vld [vmem:[#allocation4 + $0xa8] sm:$0xff]  }
 0x1dc   :  { %v1456_v30 = vpop.f32.mrb[4].mxu1 }
 0x1dd   :  { %v1457_v31 = vpop.f32.mrb[5].mxu1 }
 0x1de   :  { %v1458_v32 = vadd.f32 %v1457_v31, %v1456_v30  ;;  %v1459_v33 = vpop.f32.mrb[6].mxu1 }
 0x1df   :  { %v1460_v34 = vpop.f32.mrb[7].mxu1 }
 0x1e0   :  { %v972_v40 = vadd.f32 %v1458_v32, %v339_v36 }
 0x1fc   :  { %v1478_v37 = vpop.f32.mrb[8].mxu1 }
 0x1fd   :  { %v1479_v38 = vpop.f32.mrb[9].mxu1 }
 0x1fe   :  { %v1480_v41 = vadd.f32 %v1479_v38, %v1478_v37  ;;  %v1481_v42 = vpop.f32.mrb[10].mxu1 }
 0x1ff   :  { %v1482_v43 = vpop.f32.mrb[11].mxu1 }
 0x200   :  { %v1012_v44 = vadd.f32 %v1480_v41, %v972_v40 }
 0x202   :  { %v1019_v61 = vmax.f32 %v1012_v44, 0.0 }
 0x204   :  { %v1022_v0 = vpack.c.bf16 %v1019_v61, %v1019_v61 }
 0x21c   :  { %v930_v47 = vpop.f32.mrb[4].mxu0 }
 0x21d   :  { %v1535_v48 = vadd.f32 %v930_v47, %v331_v45  ;;  %v932_v49 = vpop.f32.mrb[5].mxu0 }
 0x21e   :  { %v1536_v50 = vadd.f32 %v932_v49, %v335_v46  ;;  %v934_v51 = vpop.f32.mrb[6].mxu0 }
 0x21f   :  { %v1017_v52 = vmax.f32 %v1535_v48, 0.0  ;;  %v935_v39 = vpop.f32.mrb[7].mxu0 }
 0x220   :  { %v1018_v53 = vmax.f32 %v1536_v50, 0.0 }
 0x221   :  { %v1020_v56 = vpack.c.bf16 %v1017_v52, %v1017_v52 }
 0x222   :  { %v1021_v54 = vpack.c.bf16 %v1018_v53, %v1018_v53 }
 0x224   :  { %1254 = vmatprep.mubr.bf16.mxu1 %v1021_v54 }
 0x225   :  { %1255 = vmatmul.mubr.bf16.vlgmr.msra.gmra.mrb[12].mxu1 %v1020_v56 }
 0x226   :  { %1516 = vmatpush3.bf16.msra.mxu1 %v1698_v55  ;;  %1531 = vmatprep.mubr.msk.bf16.mxu1 %vm1764_vm2, %v1763_v29 }
 0x227   :  { %1517 = vmatprep.subr.bf16.mxu1 %v1763_v29 }
 0x22a   :  { %1518 = vmatpush3.bf16.msra.mxu1 %v1699_v57 }
 0x22b   :  { %1519 = vmatprep.subr.bf16.mxu1 %v1763_v29 }
 0x22e   :  { %1520 = vmatpush3.bf16.msra.mxu1 %v1700_v62 }
 0x22f   :  { %1521 = vmatprep.subr.bf16.mxu1 %v1763_v29 }
 0x232   :  { %1522 = vmatpush3.bf16.msra.mxu1 %v1701_v63 }
 0x233   :  { %1523 = vmatprep.subr.bf16.mxu1 %v1763_v29 }
 0x236   :  { %1524 = vmatpush3.bf16.msra.mxu1 %v1702_v1 }
 0x237   :  { %1525 = vmatprep.subr.bf16.mxu1 %v1763_v29 }
 0x23a   :  { %1526 = vmatpush3.bf16.msra.mxu1 %v1703_v58 }
 0x23b   :  { %1527 = vmatprep.subr.bf16.mxu1 %v1763_v29 }
 0x23e   :  { %1528 = vmatpush3.bf16.msra.mxu1 %v1704_v59 }
 0x23f   :  { %1529 = vmatprep.subr.bf16.mxu1 %v1763_v29 }
 0x242   :  { %1530 = vmatpush3.bf16.msra.mxu1 %v1705_v60 }
 0x245   :  { %1532 = vmatmul.mubr.bf16.vlgmr.msra.gmra.mrb[16].mxu1 %v1022_v0 }
 0x2f8   :  { %v1500_v2 = vpop.f32.mrb[12].mxu1 }
 0x2f9   :  { %v1501_v3 = vpop.f32.mrb[13].mxu1 }
 0x2fa   :  { %v1502_v4 = vadd.f32 %v1501_v3, %v1500_v2  ;;  %v1503_v5 = vpop.f32.mrb[14].mxu1 }
 0x2fb   :  { %v1504_v6 = vpop.f32.mrb[15].mxu1 }
 0x2fc   :  { %v1257_v8 = vadd.f32 %v1502_v4, %v1415_v7 }
 0x318   :  { %v1296_v9 = vpop.f32.mrb[16].mxu1 }
 0x319   :  { %v1297_v10 = vadd.f32 %v1296_v9, %v1257_v8  ;;  %v1533_v11 = vpop.f32.mrb[17].mxu1 }
 0x31a   :  { %v1299_v12 = vpop.f32.mrb[18].mxu1 }
 0x31b   :  { %1706 = vtanh.f32 %v1297_v10  ;;  %v1534_v13 = vpop.f32.mrb[19].mxu1 }
 0x325   :  { %v1707_v14 = vpop.eup %1706 }
 0x326   :  { %v1303_v15 = vmul.f32 2.0, %v1707_v14 }
 0x328   :  { %1304 = vst [vmem:[%s1884_s7] sm:$0xff] %v1303_v15 }
 0x329   :  { %1309 = vsyncpa [#allocation3], 1 }
 0x32a   :  { %1310 = vsyncpa [#allocation5], 1 }

</bundles_post_ra>
